<compile_context>
chip_gen: v7x
topology: tpu7x:2x2x1
jax: 0.10.0
libtpu: 0.0.40
codegen_flags: <defaults>
</compile_context>

<pallas_src>
import jax
import jax.numpy as jnp
from jax.experimental import pallas as pl
from jax.experimental.pallas import tpu as pltpu


# ---------------------------------------------------------------------------
# Shared math helpers (used by both kernels and the pure-JAX reference).
# ---------------------------------------------------------------------------
def _predict(z_in, w1, b1, w2, b2):
    """Linear -> BatchNorm1d (train-mode stats) -> ReLU -> Linear."""
    # Linear 1: bf16 operands, f32 accumulation on the MXU.
    h = jnp.dot(z_in.astype(jnp.bfloat16), w1,
                preferred_element_type=jnp.float32) + b1
    # BatchNorm1d over the batch dim: biased variance, gamma=1, beta=0, eps=1e-5.
    # TODO(synk): learnable BN affine params / running-stat updates are not
    # modeled (matches a freshly initialized nn.BatchNorm1d in train mode).
    mean = jnp.mean(h, axis=0, keepdims=True)
    d = h - mean                                     # reuse centered activation
    var = jnp.mean(d * d, axis=0, keepdims=True)
    # ReLU fused with the normalization scale (rsqrt goes to the EUP).
    h = jnp.maximum(d * jax.lax.rsqrt(var + 1e-5), 0.0)
    # Linear 2.
    return jnp.dot(h.astype(jnp.bfloat16), w2,
                   preferred_element_type=jnp.float32) + b2


def _byol_cos_loss(p, tgt):
    """2 - 2 * mean_b(cos(p, tgt)) with torch's eps convention."""
    dot_pt = jnp.sum(p * tgt, axis=1, keepdims=True)
    np2 = jnp.sum(p * p, axis=1, keepdims=True)
    nt2 = jnp.sum(tgt * tgt, axis=1, keepdims=True)
    cos = dot_pt * jax.lax.rsqrt(jnp.maximum(np2 * nt2, 1e-16))
    return 2.0 - 2.0 * jnp.mean(cos)


# ---------------------------------------------------------------------------
# Kernels.
# ---------------------------------------------------------------------------
def _fused_loss_kernel(zt_ref, w1_ref, bc_ref, w2_ref, out_ref):
    """Both predictor directions via block-diagonal packing; one MXU pass/layer.

    zt_ref : [2B, 2*d_z] f32  -- rows 0:B = [z1 | z2], rows B:2B = [z2 | z1]
    w1_ref : [2*d_z, 2*d_hidden] bf16  block-diag(W1a, W1b)
    bc_ref : [1, 2*d_hidden + 2*d_z] f32  = [b1a | b1b | b2a | b2b]
    w2_ref : [2*d_hidden, 2*d_z] bf16  block-diag(W2a, W2b)
    out_ref: [2] f32 in SMEM  (loss_1to2, loss_2to1)
    """
    two_dz, two_dh = w1_ref.shape
    d_z = two_dz // 2
    b = zt_ref.shape[0] // 2

    zcat = zt_ref[:b, :]                 # [B, 2dz] inputs (already f32)
    tcat = zt_ref[b:, :]                 # [B, 2dz] targets (swapped halves)

    b1 = bc_ref[:, :two_dh]              # [1, 2dh]
    b2 = bc_ref[:, two_dh:]              # [1, 2dz]

    p = _predict(zcat, w1_ref[...], b1, w2_ref[...], b2)   # [B, 2dz]

    # Per-direction cosine loss: columns 0:d_z -> 1to2, d_z:2dz -> 2to1.
    prod = p * tcat
    p2 = p * p
    t2 = tcat * tcat
    cols = jax.lax.broadcasted_iota(jnp.int32, (1, two_dz), 1)
    m1 = (cols < d_z).astype(jnp.float32)
    m2 = 1.0 - m1

    def _loss(mask):
        dot_pt = jnp.sum(prod * mask, axis=1, keepdims=True)
        np2 = jnp.sum(p2 * mask, axis=1, keepdims=True)
        nt2 = jnp.sum(t2 * mask, axis=1, keepdims=True)
        cos = dot_pt * jax.lax.rsqrt(jnp.maximum(np2 * nt2, 1e-16))
        return 2.0 - 2.0 * jnp.mean(cos)

    out_ref[0] = _loss(m1)
    out_ref[1] = _loss(m2)


def _single_loss_kernel(z_in_ref, z_tgt_ref, w1_ref, b1_ref, w2_ref, b2_ref,
                        out_ref):
    """One direction only (used when compute_1to2 xor compute_2to1)."""
    p = _predict(z_in_ref[...], w1_ref[...], b1_ref[...], w2_ref[...], b2_ref[...])
    out_ref[0] = _byol_cos_loss(p, z_tgt_ref[...])


# ---------------------------------------------------------------------------
# pallas_call wrappers.
# ---------------------------------------------------------------------------
def _vmem_specs(n):
    return [pl.BlockSpec(memory_space=pltpu.MemorySpace.VMEM) for _ in range(n)]


def _run_fused(zg_1, zg_2, w1cat, bcat, w2cat):
    """Both BYOL predictor losses in one Pallas call (one launch, 4 input DMAs)."""
    zcat = jnp.concatenate([zg_1, zg_2], axis=-1)      # [B, 2dz]
    tcat = jnp.concatenate([zg_2, zg_1], axis=-1)      # [B, 2dz] (targets)
    zt = jnp.concatenate([zcat, tcat], axis=0)         # [2B, 2dz] one slab

    b = zg_1.shape[0]
    two_dz, two_dh = w1cat.shape
    cost = pl.CostEstimate(
        flops=4 * b * two_dz * two_dh,                 # two MXU matmuls
        transcendentals=two_dh + 2 * b,                # BN rsqrt + per-row rsqrt
        bytes_accessed=(zt.size * 4 + w1cat.size * 2 + bcat.size * 4
                        + w2cat.size * 2 + 8))

    out = pl.pallas_call(
        _fused_loss_kernel,
        out_shape=jax.ShapeDtypeStruct((2,), jnp.float32),
        in_specs=_vmem_specs(4),
        out_specs=pl.BlockSpec(memory_space=pltpu.MemorySpace.SMEM),
        cost_estimate=cost,
    )(zt, w1cat, bcat, w2cat)
    return out[0], out[1]


def _run_single(z_in, z_tgt, params):
    w1, b1, w2, b2 = params
    b, d_z = z_in.shape
    d_hidden = w1.shape[1]
    cost = pl.CostEstimate(
        flops=4 * b * d_z * d_hidden,
        transcendentals=d_hidden + b,
        bytes_accessed=(z_in.size * 4 + z_tgt.size * 4 + w1.size * 2
                        + b1.size * 4 + w2.size * 2 + b2.size * 4 + 4))
    out = pl.pallas_call(
        _single_loss_kernel,
        out_shape=jax.ShapeDtypeStruct((1,), jnp.float32),
        in_specs=_vmem_specs(6),
        out_specs=pl.BlockSpec(memory_space=pltpu.MemorySpace.SMEM),
        cost_estimate=cost,
    )(z_in, z_tgt, w1, b1, w2, b2)
    return out[0]


# ---------------------------------------------------------------------------
# Parameter init / packing.
# ---------------------------------------------------------------------------
def _init_mlp_params(key, d_z, d_hidden):
    """Deterministic synthetic init for one predictor MLP (Linear-BN-ReLU-Linear)."""
    k1, k2, k3, k4 = jax.random.split(key, 4)
    s1 = 1.0 / jnp.sqrt(jnp.float32(d_z))
    s2 = 1.0 / jnp.sqrt(jnp.float32(d_hidden))
    # Weights in bf16 (MXU-native operand, half the DMA bytes); biases in f32.
    w1 = jax.random.uniform(k1, (d_z, d_hidden), jnp.float32, -s1, s1).astype(jnp.bfloat16)
    b1 = jax.random.uniform(k2, (1, d_hidden), jnp.float32, -s1, s1)
    w2 = jax.random.uniform(k3, (d_hidden, d_z), jnp.float32, -s2, s2).astype(jnp.bfloat16)
    b2 = jax.random.uniform(k4, (1, d_z), jnp.float32, -s2, s2)
    return w1, b1, w2, b2


def _block_diag(a, b):
    za = jnp.zeros((a.shape[0], b.shape[1]), a.dtype)
    zb = jnp.zeros((b.shape[0], a.shape[1]), b.dtype)
    return jnp.concatenate([jnp.concatenate([a, za], axis=1),
                            jnp.concatenate([zb, b], axis=1)], axis=0)


def _reference_loss(z_in, z_tgt, params):
    """Pure-JAX reference with the same bf16-operand / f32-accumulate math."""
    w1, b1, w2, b2 = params
    return _byol_cos_loss(_predict(z_in, w1, b1, w2, b2), z_tgt)


class GlobalPredictorLossPallas:
    """Pallas/TPU re-implementation of GlobalPredictorLoss.forward."""

    def __init__(self, d_z, d_hidden, key):
        k1, k2 = jax.random.split(key)
        self.pred1 = _init_mlp_params(k1, d_z, d_hidden)   # predictor_1 (z1 -> z2)
        self.pred2 = _init_mlp_params(k2, d_z, d_hidden)   # predictor_2 (z2 -> z1)
        w1a, b1a, w2a, b2a = self.pred1
        w1b, b1b, w2b, b2b = self.pred2
        # Block-diagonal packing (done once): both directions share one MXU pass
        # per layer inside the fused kernel.
        self.w1cat = _block_diag(w1a, w1b)                            # [2dz, 2dh] bf16
        self.w2cat = _block_diag(w2a, w2b)                            # [2dh, 2dz] bf16
        self.bcat = jnp.concatenate([b1a, b1b, b2a, b2b], axis=1)     # [1, 2dh+2dz] f32

    def __call__(self, zg_1, zg_2, compute_1to2=True, compute_2to1=True):
        if compute_1to2 and compute_2to1:
            loss_1to2, loss_2to1 = _run_fused(zg_1, zg_2,
                                              self.w1cat, self.bcat, self.w2cat)
            return loss_1to2, loss_2to1, {}
        loss_1to2 = _run_single(zg_1, zg_2, self.pred1) if compute_1to2 else None
        loss_2to1 = _run_single(zg_2, zg_1, self.pred2) if compute_2to1 else None
        return loss_1to2, loss_2to1, {}


if __name__ == "__main__":
    B, D_Z, D_HIDDEN = 8, 32, 64   # small shapes consistent with B x d_z inputs

    root = jax.random.PRNGKey(0)
    k_params, k_z1, k_z2 = jax.random.split(root, 3)

    module = GlobalPredictorLossPallas(D_Z, D_HIDDEN, k_params)

    zg_1 = jax.random.normal(k_z1, (B, D_Z), jnp.float32)
    zg_2 = jax.random.normal(k_z2, (B, D_Z), jnp.float32)

    # Fused path (both directions, one pallas_call, block-diagonal weights).
    loss_1to2, loss_2to1, extras = module(zg_1, zg_2)
    jax.block_until_ready(loss_1to2)
    jax.block_until_ready(loss_2to1)

    # Single-direction path (compute_1to2 / compute_2to1 flags).
    only_12, none_21, _ = module(zg_1, zg_2, compute_1to2=True, compute_2to1=False)
    jax.block_until_ready(only_12)
    assert none_21 is None

    # Pure-JAX reference with matching math (checks block-diagonal packing).
    ref_12 = float(_reference_loss(zg_1, zg_2, module.pred1))
    ref_21 = float(_reference_loss(zg_2, zg_1, module.pred2))

    for v in (float(loss_1to2), float(loss_2to1), float(only_12)):
        assert jnp.isfinite(v)
        assert -1e-3 <= v <= 4.0 + 1e-3          # cosine sim in [-1, 1]
    assert abs(float(loss_1to2) - ref_12) < 5e-3
    assert abs(float(loss_2to1) - ref_21) < 5e-3
    assert abs(float(only_12) - float(loss_1to2)) < 2e-3

    print("KERNEL_OK")
</pallas_src>

<mosaic_0001>
module attributes {stable_mosaic.version = 11 : i64} {
  func.func @_fused_loss_kernel(%arg0: memref<16x64xf32, #tpu.memory_space<vmem>>, %arg1: memref<64x128xbf16, #tpu.memory_space<vmem>>, %arg2: memref<1x192xf32, #tpu.memory_space<vmem>>, %arg3: memref<128x64xbf16, #tpu.memory_space<vmem>>, %arg4: memref<2xf32, #tpu.memory_space<smem>>) attributes {dimension_semantics = [], scalar_prefetch = 0 : i64, scratch_operands = 0 : i64, tpu.core_type = #tpu.core_type<tc>} {
    %c0 = arith.constant 0 : index
    %c0_0 = arith.constant 0 : index
    %0 = vector.load %arg0[%c0, %c0_0] : memref<16x64xf32, #tpu.memory_space<vmem>>, vector<8x64xf32>
    %c8 = arith.constant 8 : index
    %c0_1 = arith.constant 0 : index
    %1 = vector.load %arg0[%c8, %c0_1] : memref<16x64xf32, #tpu.memory_space<vmem>>, vector<8x64xf32>
    %c0_2 = arith.constant 0 : index
    %c0_3 = arith.constant 0 : index
    %2 = vector.load %arg2[%c0_2, %c0_3] : memref<1x192xf32, #tpu.memory_space<vmem>>, vector<1x128xf32>
    %c0_4 = arith.constant 0 : index
    %c128 = arith.constant 128 : index
    %3 = vector.load %arg2[%c0_4, %c128] : memref<1x192xf32, #tpu.memory_space<vmem>>, vector<1x64xf32>
    %c0_5 = arith.constant 0 : index
    %c0_6 = arith.constant 0 : index
    %4 = vector.load %arg1[%c0_5, %c0_6] : memref<64x128xbf16, #tpu.memory_space<vmem>>, vector<64x128xbf16>
    %c0_7 = arith.constant 0 : index
    %c0_8 = arith.constant 0 : index
    %5 = vector.load %arg3[%c0_7, %c0_8] : memref<128x64xbf16, #tpu.memory_space<vmem>>, vector<128x64xbf16>
    %6 = arith.truncf %0 : vector<8x64xf32> to vector<8x64xbf16>
    %cst = arith.constant dense<0.000000e+00> : vector<8x128xf32>
    %7 = tpu.matmul %6, %4, %cst {dimension_numbers = #tpu.dot_dimension_numbers<[1], [0], [0], [1], [0, 0, 1, 1], [], []>} : vector<8x64xbf16>, vector<64x128xbf16>, vector<8x128xf32> -> vector<8x128xf32>
    %8 = vector.broadcast %2 : vector<1x128xf32> to vector<8x128xf32>
    %9 = arith.addf %7, %8 : vector<8x128xf32>
    %cst_9 = arith.constant dense<0.000000e+00> : vector<128xf32>
    %10 = vector.multi_reduction <add>, %9, %cst_9 [0] : vector<8x128xf32> to vector<128xf32>
    %11 = vector.shape_cast %10 : vector<128xf32> to vector<1x128xf32>
    %cst_10 = arith.constant 8.000000e+00 : f32
    %12 = vector.broadcast %cst_10 : f32 to vector<1x128xf32>
    %13 = arith.divf %11, %12 : vector<1x128xf32>
    %14 = vector.broadcast %13 : vector<1x128xf32> to vector<8x128xf32>
    %15 = arith.subf %9, %14 : vector<8x128xf32>
    %16 = arith.mulf %15, %15 : vector<8x128xf32>
    %cst_11 = arith.constant dense<0.000000e+00> : vector<128xf32>
    %17 = vector.multi_reduction <add>, %16, %cst_11 [0] : vector<8x128xf32> to vector<128xf32>
    %18 = vector.shape_cast %17 : vector<128xf32> to vector<1x128xf32>
    %cst_12 = arith.constant 8.000000e+00 : f32
    %19 = vector.broadcast %cst_12 : f32 to vector<1x128xf32>
    %20 = arith.divf %18, %19 : vector<1x128xf32>
    %cst_13 = arith.constant 9.99999974E-6 : f32
    %21 = vector.broadcast %cst_13 : f32 to vector<1x128xf32>
    %22 = arith.addf %20, %21 : vector<1x128xf32>
    %23 = math.rsqrt %22 : vector<1x128xf32>
    %24 = vector.broadcast %23 : vector<1x128xf32> to vector<8x128xf32>
    %25 = arith.mulf %15, %24 : vector<8x128xf32>
    %cst_14 = arith.constant 0.000000e+00 : f32
    %26 = vector.broadcast %cst_14 : f32 to vector<8x128xf32>
    %27 = arith.maximumf %25, %26 : vector<8x128xf32>
    %28 = arith.truncf %27 : vector<8x128xf32> to vector<8x128xbf16>
    %cst_15 = arith.constant dense<0.000000e+00> : vector<8x64xf32>
    %29 = tpu.matmul %28, %5, %cst_15 {dimension_numbers = #tpu.dot_dimension_numbers<[1], [0], [0], [1], [0, 0, 1, 1], [], []>} : vector<8x128xbf16>, vector<128x64xbf16>, vector<8x64xf32> -> vector<8x64xf32>
    %30 = vector.broadcast %3 : vector<1x64xf32> to vector<8x64xf32>
    %31 = arith.addf %29, %30 : vector<8x64xf32>
    %32 = arith.mulf %31, %1 : vector<8x64xf32>
    %33 = arith.mulf %31, %31 : vector<8x64xf32>
    %34 = arith.mulf %1, %1 : vector<8x64xf32>
    %35 = tpu.iota {dimensions = array<i32: 1>} : vector<1x64xi32>
    %c32_i32 = arith.constant 32 : i32
    %36 = vector.broadcast %c32_i32 : i32 to vector<1x64xi32>
    %37 = arith.cmpi slt, %35, %36 : vector<1x64xi32>
    %38 = arith.extui %37 : vector<1x64xi1> to vector<1x64xi32>
    %39 = arith.sitofp %38 : vector<1x64xi32> to vector<1x64xf32>
    %cst_16 = arith.constant 1.000000e+00 : f32
    %40 = vector.broadcast %cst_16 : f32 to vector<1x64xf32>
    %41 = arith.subf %40, %39 : vector<1x64xf32>
    %42 = vector.broadcast %39 : vector<1x64xf32> to vector<8x64xf32>
    %43 = arith.mulf %32, %42 : vector<8x64xf32>
    %cst_17 = arith.constant dense<0.000000e+00> : vector<8xf32>
    %44 = vector.multi_reduction <add>, %43, %cst_17 [1] : vector<8x64xf32> to vector<8xf32>
    %45 = vector.shape_cast %44 : vector<8xf32> to vector<8x1xf32>
    %46 = vector.broadcast %39 : vector<1x64xf32> to vector<8x64xf32>
    %47 = arith.mulf %33, %46 : vector<8x64xf32>
    %cst_18 = arith.constant dense<0.000000e+00> : vector<8xf32>
    %48 = vector.multi_reduction <add>, %47, %cst_18 [1] : vector<8x64xf32> to vector<8xf32>
    %49 = vector.shape_cast %48 : vector<8xf32> to vector<8x1xf32>
    %50 = vector.broadcast %39 : vector<1x64xf32> to vector<8x64xf32>
    %51 = arith.mulf %34, %50 : vector<8x64xf32>
    %cst_19 = arith.constant dense<0.000000e+00> : vector<8xf32>
    %52 = vector.multi_reduction <add>, %51, %cst_19 [1] : vector<8x64xf32> to vector<8xf32>
    %53 = vector.shape_cast %52 : vector<8xf32> to vector<8x1xf32>
    %54 = arith.mulf %49, %53 : vector<8x1xf32>
    %cst_20 = arith.constant 1.000000e-16 : f32
    %55 = vector.broadcast %cst_20 : f32 to vector<8x1xf32>
    %56 = arith.maximumf %54, %55 : vector<8x1xf32>
    %57 = math.rsqrt %56 : vector<8x1xf32>
    %58 = arith.mulf %45, %57 : vector<8x1xf32>
    %59 = vector.shape_cast %58 : vector<8x1xf32> to vector<1x8x1xf32>
    %cst_21 = arith.constant dense<0.000000e+00> : vector<1xf32>
    %60 = vector.multi_reduction <add>, %59, %cst_21 [1, 2] : vector<1x8x1xf32> to vector<1xf32>
    %61 = vector.shape_cast %60 : vector<1xf32> to vector<1x1x1xf32>
    %62 = vector.extract %61[0, 0, 0] : f32 from vector<1x1x1xf32>
    %cst_22 = arith.constant 8.000000e+00 : f32
    %63 = arith.divf %62, %cst_22 : f32
    %cst_23 = arith.constant 2.000000e+00 : f32
    %64 = arith.mulf %cst_23, %63 : f32
    %cst_24 = arith.constant 2.000000e+00 : f32
    %65 = arith.subf %cst_24, %64 : f32
    %c0_25 = arith.constant 0 : index
    %66 = memref.load %arg4[%c0_25] : memref<2xf32, #tpu.memory_space<smem>>
    memref.store %65, %arg4[%c0_25] : memref<2xf32, #tpu.memory_space<smem>>
    %67 = vector.broadcast %41 : vector<1x64xf32> to vector<8x64xf32>
    %68 = arith.mulf %32, %67 : vector<8x64xf32>
    %cst_26 = arith.constant dense<0.000000e+00> : vector<8xf32>
    %69 = vector.multi_reduction <add>, %68, %cst_26 [1] : vector<8x64xf32> to vector<8xf32>
    %70 = vector.shape_cast %69 : vector<8xf32> to vector<8x1xf32>
    %71 = vector.broadcast %41 : vector<1x64xf32> to vector<8x64xf32>
    %72 = arith.mulf %33, %71 : vector<8x64xf32>
    %cst_27 = arith.constant dense<0.000000e+00> : vector<8xf32>
    %73 = vector.multi_reduction <add>, %72, %cst_27 [1] : vector<8x64xf32> to vector<8xf32>
    %74 = vector.shape_cast %73 : vector<8xf32> to vector<8x1xf32>
    %75 = vector.broadcast %41 : vector<1x64xf32> to vector<8x64xf32>
    %76 = arith.mulf %34, %75 : vector<8x64xf32>
    %cst_28 = arith.constant dense<0.000000e+00> : vector<8xf32>
    %77 = vector.multi_reduction <add>, %76, %cst_28 [1] : vector<8x64xf32> to vector<8xf32>
    %78 = vector.shape_cast %77 : vector<8xf32> to vector<8x1xf32>
    %79 = arith.mulf %74, %78 : vector<8x1xf32>
    %cst_29 = arith.constant 1.000000e-16 : f32
    %80 = vector.broadcast %cst_29 : f32 to vector<8x1xf32>
    %81 = arith.maximumf %79, %80 : vector<8x1xf32>
    %82 = math.rsqrt %81 : vector<8x1xf32>
    %83 = arith.mulf %70, %82 : vector<8x1xf32>
    %84 = vector.shape_cast %83 : vector<8x1xf32> to vector<1x8x1xf32>
    %cst_30 = arith.constant dense<0.000000e+00> : vector<1xf32>
    %85 = vector.multi_reduction <add>, %84, %cst_30 [1, 2] : vector<1x8x1xf32> to vector<1xf32>
    %86 = vector.shape_cast %85 : vector<1xf32> to vector<1x1x1xf32>
    %87 = vector.extract %86[0, 0, 0] : f32 from vector<1x1x1xf32>
    %cst_31 = arith.constant 8.000000e+00 : f32
    %88 = arith.divf %87, %cst_31 : f32
    %cst_32 = arith.constant 2.000000e+00 : f32
    %89 = arith.mulf %cst_32, %88 : f32
    %cst_33 = arith.constant 2.000000e+00 : f32
    %90 = arith.subf %cst_33, %89 : f32
    %c1 = arith.constant 1 : index
    %91 = memref.load %arg4[%c1] : memref<2xf32, #tpu.memory_space<smem>>
    memref.store %90, %arg4[%c1] : memref<2xf32, #tpu.memory_space<smem>>
    return
  }
}

</mosaic_0001>

<bundles_post_ra>
// kernel: tpu_custom_call.1
= control target key start
LH: loop header
LB: loop body
LE: loop exit
PB: predicated region body
PF: predicated region fallthrough
CT: control target
= control target key end

     0   :  { %v426_v1 = vmov 0.0   ;;  %vm427_vm0 = vmmov 0   ;;  %s536_s0 = inlined_call_operand.vmem [shape: f32[16,64], index: 0, kind: input, shape index: {}]   ;;  %s537_s1 = inlined_call_operand.vmem [shape: bf16[64,128], index: 1, kind: input, shape index: {}]   ;;  %s538_s2 = inlined_call_operand.vmem [shape: f32[1,192], index: 2, kind: input, shape index: {}]   ;;  %s539_s3 = inlined_call_operand.vmem [shape: bf16[128,64], index: 3, kind: input, shape index: {}]   ;;  %s540_s4 = inlined_call_operand.hbm [shape: f32[2], index: 4, kind: output, shape index: {}]  }
   0x1   :  { %v396_v0 = vld [vmem:[%s537_s1] sm:$0xff]   ;;  %357 = vmatprep.subr.bf16.mxu0 %v426_v1  ;;  %369 = vmatprep.subr.bf16.mxu1 %v426_v1  ;;  %v397_v2 = vld [vmem:[%s537_s1 + $0x8] sm:$0xff]   ;;  %v398_v3 = vld [vmem:[%s537_s1 + $0x10] sm:$0xff]  }
   0x2   :  { %358 = vmatpush3.bf16.msra.mxu0 %v396_v0  ;;  %365 = vmatprep.mubr.msk.bf16.mxu0 %vm427_vm0, %v426_v1  ;;  %v399_v4 = vld [vmem:[%s537_s1 + $0x18] sm:$0xff]   ;;  %v19_v5 = vld [vmem:[%s536_s0] sm:$0xff] }
   0x3   :  { %359 = vmatprep.subr.bf16.mxu0 %v426_v1  ;;  %385 = vmatprep.mubr.msk.bf16.mxu1 %vm427_vm0, %v426_v1 }
   0x6   :  { %360 = vmatpush3.bf16.msra.mxu0 %v397_v2 }
   0x7   :  { %361 = vmatprep.subr.bf16.mxu0 %v426_v1 }
   0xa   :  { %362 = vmatpush3.bf16.msra.mxu0 %v398_v3 }
   0xb   :  { %9 = vsyncpa [#allocation3], 0  ;;  %363 = vmatprep.subr.bf16.mxu0 %v426_v1  ;;  %v47_v6 = vpack.c.bf16 %v19_v5, %v19_v5  ;;  %vm78_vm1 = vcmask 523264   ;;  %v400_v7 = vld [vmem:[%s539_s3] sm:$0xff]   ;;  %v401_v8 = vld [vmem:[%s539_s3 + $0x8] sm:$0xff]   ;;  %v241_v42 = vlaneseq  ;;  %vm263_vm3 = vcmask 7168  }
   0xc   :  { %370 = vmatpush3.bf16.msra.mxu1 %v400_v7  ;;  %v402_v9 = vld [vmem:[%s539_s3 + $0x10] sm:$0xff]   ;;  %v403_v10 = vld [vmem:[%s539_s3 + $0x18] sm:$0xff]   ;;  %v404_v11 = vld [vmem:[%s539_s3 + $0x20] sm:$0xff]   ;;  %s414_s1 = scalar_lea.hbm %s540_s4, 16 }
   0xd   :  { %371 = vmatprep.subr.bf16.mxu1 %v426_v1  ;;  %v405_v12 = vld [vmem:[%s539_s3 + $0x28] sm:$0xff]   ;;  %v406_v13 = vld [vmem:[%s539_s3 + $0x30] sm:$0xff]   ;;  %v407_v14 = vld [vmem:[%s539_s3 + $0x38] sm:$0xff]   ;;  %v242_v43 = vand.u32 127, %v241_v42  ;;  %p415_p0 = scmp.ne.s32.totalorder %s540_s4, %s414_s1  ;;  %p418_p1 = scmp.lt.u32.totalorder %s414_s1, %s540_s4 }
   0xe   :  { %364 = vmatpush3.bf16.msra.mxu0 %v399_v4  ;;  %v327_v15 = vld [vmem:[%s538_s2] ss:$0 sm:$0xff]  ;;  %v333_v44 = vld [vmem:[%s538_s2 + $0x1] ss:$0 sm:$0xff]  ;;  %v20_v46 = vld [vmem:[%s536_s0 + $0x8] sm:$0xff] }
   0xf   :  { %vm243_vm2 = vcmp.lt.s32.totalorder %v242_v43, 32  ;;  %v240_v51 = vmul.f32 %v20_v46, %v20_v46  ;;  %p420_p2 = pnand %p418_p1, %p415_p0 }
  0x10   :  { %372 = vmatpush3.bf16.msra.mxu1 %v401_v8  ;;  %v342_v45 = vsel %vm243_vm2, 1.0, %v426_v1 }
  0x11   :  { %366 = vmatmul.mubr.msk.bf16.vlgmr.msra.gmra.mrb[0].mxu0 %vm78_vm1, %v47_v6  ;;  %373 = vmatprep.subr.bf16.mxu1 %v426_v1  ;;  %v246_v50 = vsub.f32 1.0, %v342_v45  ;;  %v255_v58 = vmul.f32 %v342_v45, %v240_v51 }
  0x13   :  { %v289_v57 = vmul.f32 %v246_v50, %v240_v51  ;;  %v256_v63 = vsel %vm78_vm1, %v255_v58, 0.0 }
  0x14   :  { %374 = vmatpush3.bf16.msra.mxu1 %v402_v9 }
  0x15   :  { %375 = vmatprep.subr.bf16.mxu1 %v426_v1  ;;  %v290_v62 = vsel %vm78_vm1, %v289_v57, 0.0 }
  0x18   :  { %376 = vmatpush3.bf16.msra.mxu1 %v403_v10 }
  0x19   :  { %377 = vmatprep.subr.bf16.mxu1 %v426_v1 }
  0x1c   :  { %378 = vmatpush3.bf16.msra.mxu1 %v404_v11 }
  0x1d   :  { %379 = vmatprep.subr.bf16.mxu1 %v426_v1 }
  0x20   :  { %380 = vmatpush3.bf16.msra.mxu1 %v405_v12 }
  0x21   :  { %381 = vmatprep.subr.bf16.mxu1 %v426_v1 }
  0x24   :  { %382 = vmatpush3.bf16.msra.mxu1 %v406_v13 }
  0x25   :  { %383 = vmatprep.subr.bf16.mxu1 %v426_v1 }
  0x28   :  { %384 = vmatpush3.bf16.msra.mxu1 %v407_v14 }
  0xe4   :  { %v116_v16 = vpop.f32.mrb[0].mxu0 }
  0xe5   :  { %v117_v17 = vadd.f32 %v327_v15, %v116_v16  ;;  %v367_v18 = vpop.f32.mrb[1].mxu0 }
  0xe6   :  { %v119_v19 = vpop.f32.mrb[2].mxu0 }
  0xe7   :  { %v122_v20 = vrot.slane %v117_v17, 4  ;;  %v368_v21 = vpop.f32.mrb[3].mxu0 }
  0xe9   :  { %v123_v22 = vadd.f32 %v122_v20, %v117_v17 }
  0xeb   :  { %v124_v23 = vrot.slane %v123_v22, 2 }
  0xed   :  { %v125_v24 = vadd.f32 %v124_v23, %v123_v22 }
  0xef   :  { %v126_v25 = vrot.slane %v125_v24, 1 }
  0xf1   :  { %v127_v26 = vadd.f32 %v126_v25, %v125_v24 }
  0xf3   :  { %v129_v27 = vmul.f32 0.125, %v127_v26 }
  0xf5   :  { %v130_v28 = vsub.f32 %v117_v17, %v129_v27 }
  0xf7   :  { %v131_v29 = vmul.f32 %v130_v28, %v130_v28 }
  0xf9   :  { %v132_v30 = vrot.slane %v131_v29, 4 }
  0xfb   :  { %v133_v31 = vadd.f32 %v132_v30, %v131_v29 }
  0xfd   :  { %v134_v32 = vrot.slane %v133_v31, 2 }
  0xff   :  { %v135_v33 = vadd.f32 %v134_v32, %v133_v31 }
 0x101   :  { %v136_v34 = vrot.slane %v135_v33, 1 }
 0x103   :  { %v137_v35 = vadd.f32 %v136_v34, %v135_v33 }
 0x105   :  { %v138_v36 = vmul.f32 0.125, %v137_v35 }
 0x107   :  { %v139_v37 = vadd.f32 1e-05, %v138_v36 }
 0x109   :  { %408 = vrsqrt.f32 %v139_v37 }
 0x113   :  { %v409_v38 = vpop.eup %408 }
 0x114   :  { %v141_v39 = vmul.f32 %v409_v38, %v130_v28 }
 0x116   :  { %v142_v40 = vmax.f32 %v141_v39, 0.0 }
 0x118   :  { %v143_v41 = vpack.c.bf16 %v142_v40, %v142_v40 }
 0x11a   :  { %386 = vmatmul.mubr.bf16.vlgmr.msra.gmra.mrb[0].mxu1 %v143_v41 }
 0x1ed   :  { %v232_v47 = vpop.f32.mrb[0].mxu1 }
 0x1ee   :  { %v233_v48 = vadd.f32 %v333_v44, %v232_v47  ;;  %v387_v49 = vpop.f32.mrb[1].mxu1 }
 0x1ef   :  { %v235_v52 = vpop.f32.mrb[2].mxu1 }
 0x1f0   :  { %v239_v53 = vmul.f32 %v233_v48, %v233_v48  ;;  %v388_v54 = vpop.f32.mrb[3].mxu1  ;;  %v238_v59 = vmul.f32 %v233_v48, %v20_v46 }
 0x1f2   :  { %v285_v55 = vmul.f32 %v246_v50, %v239_v53  ;;  %v251_v56 = vmul.f32 %v342_v45, %v239_v53  ;;  %v281_v0 = vmul.f32 %v246_v50, %v238_v59  ;;  %v247_v1 = vmul.f32 %v342_v45, %v238_v59 }
 0x1f4   :  { %v286_v60 = vsel %vm78_vm1, %v285_v55, 0.0  ;;  %v252_v61 = vsel %vm78_vm1, %v251_v56, 0.0  ;;  %v282_v2 = vsel %vm78_vm1, %v281_v0, 0.0  ;;  %v248_v3 = vsel %vm78_vm1, %v247_v1, 0.0 }
 0x1f5   :  { %287 = vadd.xlane.f32.xlu1 %v286_v60  ;;  %253 = vadd.xlane.f32.xlu0 %v252_v61 }
 0x1f9   :  { %291 = vadd.xlane.f32.xlu1 %v290_v62  ;;  %257 = vadd.xlane.f32.xlu0 %v256_v63 }
 0x1fd   :  { %283 = vadd.xlane.f32.xlu1 %v282_v2  ;;  %249 = vadd.xlane.f32.xlu0 %v248_v3 }
 0x282   :  { %v288_v4 = vpop.xlane.xlu1 %287  ;;  %v254_v5 = vpop.xlane.xlu0 %253 }
 0x286   :  { %v292_v6 = vpop.xlane.xlu1 %291  ;;  %v258_v7 = vpop.xlane.xlu0 %257 }
 0x287   :  { %v293_v8 = vmul.f32 %v292_v6, %v288_v4  ;;  %v259_v9 = vmul.f32 %v258_v7, %v254_v5 }
 0x289   :  { %v294_v10 = vmax.f32 %v293_v8, 1e-16  ;;  %v260_v11 = vmax.f32 %v259_v9, 1e-16 }
 0x28a   :  { %v284_v13 = vpop.xlane.xlu1 %283  ;;  %v250_v16 = vpop.xlane.xlu0 %249 }
 0x28b   :  { %410 = vrsqrt.f32 %v294_v10 }
 0x28c   :  { %412 = vrsqrt.f32 %v260_v11 }
 0x295   :  { %v411_v12 = vpop.eup %410 }
 0x296   :  { %v413_v14 = vpop.eup %412  ;;  %v296_v15 = vmul.f32 %v411_v12, %v284_v13 }
 0x297   :  { %v262_v17 = vmul.f32 %v413_v14, %v250_v16 }
 0x298   :  { %v297_v18 = vsel %vm263_vm3, %v296_v15, 0.0 }
 0x299   :  { %298 = vadd.xlane.f32.xlu1 %v297_v18  ;;  %v264_v19 = vsel %vm263_vm3, %v262_v17, 0.0 }
 0x29a   :  { %265 = vadd.xlane.f32.xlu0 %v264_v19 }
 0x326   :  { %v299_v20 = vpop.xlane.xlu1 %298 }
 0x327   :  { %v300_v21 = vrot.slane %v299_v20, 4  ;;  %v266_v22 = vpop.xlane.xlu0 %265 }
 0x328   :  { %v267_v23 = vrot.slane %v266_v22, 4 }
 0x329   :  { %v301_v24 = vadd.f32 %v300_v21, %v299_v20 }
 0x32a   :  { %v268_v25 = vadd.f32 %v267_v23, %v266_v22 }
 0x32b   :  { %v302_v26 = vrot.slane %v301_v24, 2 }
 0x32c   :  { %v269_v27 = vrot.slane %v268_v25, 2 }
 0x32d   :  { %v303_v28 = vadd.f32 %v302_v26, %v301_v24 }
 0x32e   :  { %v270_v29 = vadd.f32 %v269_v27, %v268_v25 }
 0x32f   :  { %v304_v30 = vrot.slane %v303_v28, 1 }
 0x330   :  { %v271_v31 = vrot.slane %v270_v29, 1 }
 0x331   :  { %v305_v32 = vadd.f32 %v304_v30, %v303_v28 }
 0x332   :  { %v272_v33 = vadd.f32 %v271_v31, %v270_v29 }
 0x334   :  { %389 = vpush %v272_v33 }
 0x335   :  { %391 = vpush %v305_v32 }
 0x365   :  { %s390_s0 = spop %389 }
 0x366   :  { %s276_s2 = smul.f32 0.125, %s390_s0  ;;  %s392_s19 = spop %391 }
 0x367   :  { %s309_s20 = smul.f32 0.125, %s392_s19 }
 0x368   :  { %s277_s21 = smul.f32 2.0, %s276_s2 }
 0x369   :  { %s310_s22 = smul.f32 2.0, %s309_s20 }
 0x36a   :  { %s278_s23 = ssub.f32 2.0, %s277_s21 }
 0x36b   :  { %s311_s24 = ssub.f32 2.0, %s310_s22 }
 0x36c   :  { %280 = sst [smem:[#allocation2]] %s278_s23 }
 0x36d   :  { %313 = sst [smem:[#allocation2 + $0x1]] %s311_s24 }
 0x36e   :  { %423 = shalt.err (!%p420_p2)
}
 0x36f   :  { %s428_s5 = smov [#allocation2]  }
 0x370   :  { %321 = dma.smem_to_hbm %s428_s5, 16, %s540_s4, [#allocation3]  }
 0x371   :  { %424 = dma.done.wait [#allocation3], 16  }
 0x372   :  { %425 = vsyncadd [#allocation3], 4294967280 }
 0x373   :  { %325 = sfence }
 0x374   :  { %326 = vsyncpa [#allocation3], 1 }

</bundles_post_ra>
